<compile_context>
chip_gen: v6e
topology: v6e:2x2x1
jax: 0.10.0
libtpu: 0.0.40
codegen_flags: <defaults>
</compile_context>

<pallas_src>
import jax
import jax.numpy as jnp
from jax.experimental import pallas as pl
from jax.experimental.pallas import tpu as pltpu

NEG_SLOPE = 0.01   # PyTorch nn.LeakyReLU default
OUT_PAD = 128      # lane-dense output slab width


def _leaky_relu(x):
    # max(x, slope*x) == LeakyReLU for slope < 1; cheaper than compare+select.
    return jnp.maximum(x, NEG_SLOPE * x)


def discriminator_kernel(x_ref, c_ref,
                         w1x_ref, w1c_ref, b1_ref,
                         w2_ref, b2_ref,
                         w3_ref, b3_ref,
                         w4_ref, b4_ref,
                         o_ref):
    # Layer 1 without a concat: X @ W1x + C @ W1c + b1  (bf16 MXU, fp32 acc).
    x = x_ref[...].astype(jnp.bfloat16)
    c = c_ref[...].astype(jnp.bfloat16)
    h = (jnp.dot(x, w1x_ref[...], preferred_element_type=jnp.float32)
         + jnp.dot(c, w1c_ref[...], preferred_element_type=jnp.float32)
         + b1_ref[...])
    h = _leaky_relu(h)

    # Layer 2
    h = jnp.dot(h.astype(jnp.bfloat16), w2_ref[...],
                preferred_element_type=jnp.float32) + b2_ref[...]
    h = _leaky_relu(h)

    # Layer 3
    h = jnp.dot(h.astype(jnp.bfloat16), w3_ref[...],
                preferred_element_type=jnp.float32) + b3_ref[...]
    h = _leaky_relu(h)

    # Layer 4 (padded to 128 output lanes) + sigmoid.
    logit = jnp.dot(h.astype(jnp.bfloat16), w4_ref[...],
                    preferred_element_type=jnp.float32) + b4_ref[...]
    t = jnp.exp(-logit)
    o_ref[...] = pl.reciprocal(1.0 + t, approx=True).astype(o_ref.dtype)


def discriminator_forward(X, C, params, *, tile_b=512):
    """X: (B, in_dim), C: (B, c_dim). Returns (B, 1) probabilities (fp32)."""
    assert X.ndim == 2 and C.ndim == 2 and X.shape[0] == C.shape[0]
    B, in_dim = X.shape
    c_dim = C.shape[1]

    (w1, b1), (w2, b2), (w3, b3), (w4, b4) = params
    assert w1.shape[0] == in_dim + c_dim

    # Split the first layer so no HBM-materialized concat of (X, C) is needed.
    w1x = w1[:in_dim].astype(jnp.bfloat16)
    w1c = w1[in_dim:].astype(jnp.bfloat16)
    w2b = w2.astype(jnp.bfloat16)
    w3b = w3.astype(jnp.bfloat16)
    # Lane-dense output: zero-pad the final layer from 1 to OUT_PAD columns.
    w4p = jnp.pad(w4, ((0, 0), (0, OUT_PAD - w4.shape[1]))).astype(jnp.bfloat16)
    b4p = jnp.pad(b4, ((0, 0), (0, OUT_PAD - b4.shape[1]))).astype(jnp.float32)
    b1f = b1.astype(jnp.float32)
    b2f = b2.astype(jnp.float32)
    b3f = b3.astype(jnp.float32)

    # Batch tiling: shrink the tile for tiny batches, pad B up to a multiple.
    tb = min(tile_b, ((B + 7) // 8) * 8)
    b_pad = ((B + tb - 1) // tb) * tb
    Xp = jnp.pad(X.astype(jnp.float32), ((0, b_pad - B), (0, 0)))
    Cp = jnp.pad(C.astype(jnp.float32), ((0, b_pad - B), (0, 0)))
    n_tiles = b_pad // tb

    def resident(arr):
        # Full-array block that maps every grid step to block (0, 0):
        # DMA'd into VMEM once, stays resident across all batch tiles.
        return pl.BlockSpec(arr.shape, lambda i: (0, 0))

    out = pl.pallas_call(
        discriminator_kernel,
        out_shape=jax.ShapeDtypeStruct((b_pad, OUT_PAD), jnp.float32),
        grid=(n_tiles,),
        in_specs=[
            pl.BlockSpec((tb, in_dim), lambda i: (i, 0)),   # X tile
            pl.BlockSpec((tb, c_dim), lambda i: (i, 0)),    # C tile
            resident(w1x), resident(w1c), resident(b1f),
            resident(w2b), resident(b2f),
            resident(w3b), resident(b3f),
            resident(w4p), resident(b4p),
        ],
        out_specs=pl.BlockSpec((tb, OUT_PAD), lambda i: (i, 0)),
        compiler_params=pltpu.CompilerParams(
            dimension_semantics=("parallel",),   # v7x: shard batch over 2 TCs
            vmem_limit_bytes=32 * 1024 * 1024,   # safe on v5e/v6e/v7x
        ),
    )(Xp, Cp, w1x, w1c, b1f, w2b, b2f, w3b, b3f, w4p, b4p)

    return out[:B, 0:1]


def init_params(key, in_dim, c_dim):
    """Deterministic synthetic init. Weights are (in, out); biases are (1, out)."""
    dims = [(in_dim + c_dim, 256), (256, 256), (256, 256), (256, 1)]
    params = []
    for i, (fan_in, fan_out) in enumerate(dims):
        kw, kb = jax.random.split(jax.random.fold_in(key, i))
        bound = 1.0 / jnp.sqrt(fan_in)
        w = jax.random.uniform(kw, (fan_in, fan_out), jnp.float32, -bound, bound)
        b = jax.random.uniform(kb, (1, fan_out), jnp.float32, -bound, bound)
        params.append((w, b))
    return params


def reference_forward(X, C, params):
    h = jnp.concatenate([X, C], axis=1).astype(jnp.float32)
    (w1, b1), (w2, b2), (w3, b3), (w4, b4) = params
    h = _leaky_relu(h @ w1 + b1)
    h = _leaky_relu(h @ w2 + b2)
    h = _leaky_relu(h @ w3 + b3)
    return jax.nn.sigmoid(h @ w4 + b4)


if __name__ == "__main__":
    key = jax.random.PRNGKey(0)
    B, in_dim, c_dim = 4, 16, 8

    kx, kc, kp = jax.random.split(key, 3)
    X = jax.random.normal(kx, (B, in_dim), jnp.float32)
    C = jax.random.normal(kc, (B, c_dim), jnp.float32)
    params = init_params(kp, in_dim, c_dim)

    out = discriminator_forward(X, C, params)
    out = jax.block_until_ready(out)

    ref = reference_forward(X, C, params)
    assert out.shape == (B, 1)
    # bf16 matmuls + approx reciprocal -> loosened tolerance vs fp32 reference.
    assert jnp.allclose(out, ref, atol=2e-2, rtol=2e-2), "mismatch vs JAX reference"

    print("KERNEL_OK")
</pallas_src>

<mosaic_0001>
module attributes {stable_mosaic.version = 11 : i64} {
  func.func @discriminator_kernel(%arg0: i32, %arg1: memref<8x16xf32, #tpu.memory_space<vmem>>, %arg2: memref<8x8xf32, #tpu.memory_space<vmem>>, %arg3: memref<16x256xbf16, #tpu.memory_space<vmem>>, %arg4: memref<8x256xbf16, #tpu.memory_space<vmem>>, %arg5: memref<1x256xf32, #tpu.memory_space<vmem>>, %arg6: memref<256x256xbf16, #tpu.memory_space<vmem>>, %arg7: memref<1x256xf32, #tpu.memory_space<vmem>>, %arg8: memref<256x256xbf16, #tpu.memory_space<vmem>>, %arg9: memref<1x256xf32, #tpu.memory_space<vmem>>, %arg10: memref<256x128xbf16, #tpu.memory_space<vmem>>, %arg11: memref<1x128xf32, #tpu.memory_space<vmem>>, %arg12: memref<8x128xf32, #tpu.memory_space<vmem>>) attributes {dimension_semantics = [#tpu.dimension_semantics<parallel>], iteration_bounds = array<i64: 1>, scalar_prefetch = 0 : i64, scratch_operands = 0 : i64, tpu.core_type = #tpu.core_type<tc>, window_params = [{transform_indices = @transform_0, window_bounds = array<i64: 8, 16>}, {transform_indices = @transform_1, window_bounds = array<i64: 8, 8>}, {pipeline_mode = #tpu.pipeline_mode<synchronous>, transform_indices = @transform_2, window_bounds = array<i64: 16, 256>}, {pipeline_mode = #tpu.pipeline_mode<synchronous>, transform_indices = @transform_3, window_bounds = array<i64: 8, 256>}, {pipeline_mode = #tpu.pipeline_mode<synchronous>, transform_indices = @transform_4, window_bounds = array<i64: 1, 256>}, {pipeline_mode = #tpu.pipeline_mode<synchronous>, transform_indices = @transform_5, window_bounds = array<i64: 256, 256>}, {pipeline_mode = #tpu.pipeline_mode<synchronous>, transform_indices = @transform_6, window_bounds = array<i64: 1, 256>}, {pipeline_mode = #tpu.pipeline_mode<synchronous>, transform_indices = @transform_7, window_bounds = array<i64: 256, 256>}, {pipeline_mode = #tpu.pipeline_mode<synchronous>, transform_indices = @transform_8, window_bounds = array<i64: 1, 256>}, {pipeline_mode = #tpu.pipeline_mode<synchronous>, transform_indices = @transform_9, window_bounds = array<i64: 256, 128>}, {pipeline_mode = #tpu.pipeline_mode<synchronous>, transform_indices = @transform_10, window_bounds = array<i64: 1, 128>}, {transform_indices = @transform_11, window_bounds = array<i64: 8, 128>}]} {
    %c0 = arith.constant 0 : index
    %c0_0 = arith.constant 0 : index
    %0 = vector.load %arg1[%c0, %c0_0] : memref<8x16xf32, #tpu.memory_space<vmem>>, vector<8x16xf32>
    %1 = arith.truncf %0 : vector<8x16xf32> to vector<8x16xbf16>
    %c0_1 = arith.constant 0 : index
    %c0_2 = arith.constant 0 : index
    %2 = vector.load %arg2[%c0_1, %c0_2] : memref<8x8xf32, #tpu.memory_space<vmem>>, vector<8x8xf32>
    %3 = arith.truncf %2 : vector<8x8xf32> to vector<8x8xbf16>
    %c0_3 = arith.constant 0 : index
    %c0_4 = arith.constant 0 : index
    %4 = vector.load %arg3[%c0_3, %c0_4] : memref<16x256xbf16, #tpu.memory_space<vmem>>, vector<16x256xbf16>
    %cst = arith.constant dense<0.000000e+00> : vector<8x256xf32>
    %5 = tpu.matmul %1, %4, %cst {dimension_numbers = #tpu.dot_dimension_numbers<[1], [0], [0], [1], [0, 0, 1, 1], [], []>} : vector<8x16xbf16>, vector<16x256xbf16>, vector<8x256xf32> -> vector<8x256xf32>
    %c0_5 = arith.constant 0 : index
    %c0_6 = arith.constant 0 : index
    %6 = vector.load %arg4[%c0_5, %c0_6] : memref<8x256xbf16, #tpu.memory_space<vmem>>, vector<8x256xbf16>
    %cst_7 = arith.constant dense<0.000000e+00> : vector<8x256xf32>
    %7 = tpu.matmul %3, %6, %cst_7 {dimension_numbers = #tpu.dot_dimension_numbers<[1], [0], [0], [1], [0, 0, 1, 1], [], []>} : vector<8x8xbf16>, vector<8x256xbf16>, vector<8x256xf32> -> vector<8x256xf32>
    %8 = arith.addf %5, %7 : vector<8x256xf32>
    %c0_8 = arith.constant 0 : index
    %c0_9 = arith.constant 0 : index
    %9 = vector.load %arg5[%c0_8, %c0_9] : memref<1x256xf32, #tpu.memory_space<vmem>>, vector<1x256xf32>
    %10 = vector.broadcast %9 : vector<1x256xf32> to vector<8x256xf32>
    %11 = arith.addf %8, %10 : vector<8x256xf32>
    %cst_10 = arith.constant 0.00999999977 : f32
    %12 = vector.broadcast %cst_10 : f32 to vector<8x256xf32>
    %13 = arith.mulf %12, %11 : vector<8x256xf32>
    %14 = arith.maximumf %11, %13 : vector<8x256xf32>
    %15 = arith.truncf %14 : vector<8x256xf32> to vector<8x256xbf16>
    %c0_11 = arith.constant 0 : index
    %c0_12 = arith.constant 0 : index
    %16 = vector.load %arg6[%c0_11, %c0_12] : memref<256x256xbf16, #tpu.memory_space<vmem>>, vector<256x256xbf16>
    %cst_13 = arith.constant dense<0.000000e+00> : vector<8x256xf32>
    %17 = tpu.matmul %15, %16, %cst_13 {dimension_numbers = #tpu.dot_dimension_numbers<[1], [0], [0], [1], [0, 0, 1, 1], [], []>} : vector<8x256xbf16>, vector<256x256xbf16>, vector<8x256xf32> -> vector<8x256xf32>
    %c0_14 = arith.constant 0 : index
    %c0_15 = arith.constant 0 : index
    %18 = vector.load %arg7[%c0_14, %c0_15] : memref<1x256xf32, #tpu.memory_space<vmem>>, vector<1x256xf32>
    %19 = vector.broadcast %18 : vector<1x256xf32> to vector<8x256xf32>
    %20 = arith.addf %17, %19 : vector<8x256xf32>
    %cst_16 = arith.constant 0.00999999977 : f32
    %21 = vector.broadcast %cst_16 : f32 to vector<8x256xf32>
    %22 = arith.mulf %21, %20 : vector<8x256xf32>
    %23 = arith.maximumf %20, %22 : vector<8x256xf32>
    %24 = arith.truncf %23 : vector<8x256xf32> to vector<8x256xbf16>
    %c0_17 = arith.constant 0 : index
    %c0_18 = arith.constant 0 : index
    %25 = vector.load %arg8[%c0_17, %c0_18] : memref<256x256xbf16, #tpu.memory_space<vmem>>, vector<256x256xbf16>
    %cst_19 = arith.constant dense<0.000000e+00> : vector<8x256xf32>
    %26 = tpu.matmul %24, %25, %cst_19 {dimension_numbers = #tpu.dot_dimension_numbers<[1], [0], [0], [1], [0, 0, 1, 1], [], []>} : vector<8x256xbf16>, vector<256x256xbf16>, vector<8x256xf32> -> vector<8x256xf32>
    %c0_20 = arith.constant 0 : index
    %c0_21 = arith.constant 0 : index
    %27 = vector.load %arg9[%c0_20, %c0_21] : memref<1x256xf32, #tpu.memory_space<vmem>>, vector<1x256xf32>
    %28 = vector.broadcast %27 : vector<1x256xf32> to vector<8x256xf32>
    %29 = arith.addf %26, %28 : vector<8x256xf32>
    %cst_22 = arith.constant 0.00999999977 : f32
    %30 = vector.broadcast %cst_22 : f32 to vector<8x256xf32>
    %31 = arith.mulf %30, %29 : vector<8x256xf32>
    %32 = arith.maximumf %29, %31 : vector<8x256xf32>
    %33 = arith.truncf %32 : vector<8x256xf32> to vector<8x256xbf16>
    %c0_23 = arith.constant 0 : index
    %c0_24 = arith.constant 0 : index
    %34 = vector.load %arg10[%c0_23, %c0_24] : memref<256x128xbf16, #tpu.memory_space<vmem>>, vector<256x128xbf16>
    %cst_25 = arith.constant dense<0.000000e+00> : vector<8x128xf32>
    %35 = tpu.matmul %33, %34, %cst_25 {dimension_numbers = #tpu.dot_dimension_numbers<[1], [0], [0], [1], [0, 0, 1, 1], [], []>} : vector<8x256xbf16>, vector<256x128xbf16>, vector<8x128xf32> -> vector<8x128xf32>
    %c0_26 = arith.constant 0 : index
    %c0_27 = arith.constant 0 : index
    %36 = vector.load %arg11[%c0_26, %c0_27] : memref<1x128xf32, #tpu.memory_space<vmem>>, vector<1x128xf32>
    %37 = vector.broadcast %36 : vector<1x128xf32> to vector<8x128xf32>
    %38 = arith.addf %35, %37 : vector<8x128xf32>
    %cst_28 = arith.constant 0.000000e+00 : f32
    %39 = vector.broadcast %cst_28 : f32 to vector<8x128xf32>
    %40 = arith.subf %39, %38 : vector<8x128xf32>
    %41 = math.exp %40 : vector<8x128xf32>
    %cst_29 = arith.constant 1.000000e+00 : f32
    %42 = vector.broadcast %cst_29 : f32 to vector<8x128xf32>
    %43 = arith.addf %42, %41 : vector<8x128xf32>
    %44 = tpu.reciprocal %43 {approx = true} : vector<8x128xf32> -> vector<8x128xf32>
    %c0_30 = arith.constant 0 : index
    %c0_31 = arith.constant 0 : index
    %45 = vector.load %arg12[%c0_30, %c0_31] : memref<8x128xf32, #tpu.memory_space<vmem>>, vector<8x128xf32>
    tpu.vector_store %arg12[%c0_30, %c0_31], %44 {strides = array<i32>} : memref<8x128xf32, #tpu.memory_space<vmem>>, vector<8x128xf32>,
    return
  }
  func.func @transform_0(%arg0: i32) -> (i32, i32) {
    %c0_i32 = arith.constant 0 : i32
    %c0_i32_0 = arith.constant 0 : i32
    return %arg0, %c0_i32 : i32, i32
  }
  func.func @transform_1(%arg0: i32) -> (i32, i32) {
    %c0_i32 = arith.constant 0 : i32
    %c0_i32_0 = arith.constant 0 : i32
    return %arg0, %c0_i32 : i32, i32
  }
  func.func @transform_2(%arg0: i32) -> (i32, i32) {
    %c0_i32 = arith.constant 0 : i32
    %c0_i32_0 = arith.constant 0 : i32
    %c0_i32_1 = arith.constant 0 : i32
    return %c0_i32, %c0_i32_0 : i32, i32
  }
  func.func @transform_3(%arg0: i32) -> (i32, i32) {
    %c0_i32 = arith.constant 0 : i32
    %c0_i32_0 = arith.constant 0 : i32
    %c0_i32_1 = arith.constant 0 : i32
    return %c0_i32, %c0_i32_0 : i32, i32
  }
  func.func @transform_4(%arg0: i32) -> (i32, i32) {
    %c0_i32 = arith.constant 0 : i32
    %c0_i32_0 = arith.constant 0 : i32
    %c0_i32_1 = arith.constant 0 : i32
    return %c0_i32, %c0_i32_0 : i32, i32
  }
  func.func @transform_5(%arg0: i32) -> (i32, i32) {
    %c0_i32 = arith.constant 0 : i32
    %c0_i32_0 = arith.constant 0 : i32
    %c0_i32_1 = arith.constant 0 : i32
    return %c0_i32, %c0_i32_0 : i32, i32
  }
  func.func @transform_6(%arg0: i32) -> (i32, i32) {
    %c0_i32 = arith.constant 0 : i32
    %c0_i32_0 = arith.constant 0 : i32
    %c0_i32_1 = arith.constant 0 : i32
    return %c0_i32, %c0_i32_0 : i32, i32
  }
  func.func @transform_7(%arg0: i32) -> (i32, i32) {
    %c0_i32 = arith.constant 0 : i32
    %c0_i32_0 = arith.constant 0 : i32
    %c0_i32_1 = arith.constant 0 : i32
    return %c0_i32, %c0_i32_0 : i32, i32
  }
  func.func @transform_8(%arg0: i32) -> (i32, i32) {
    %c0_i32 = arith.constant 0 : i32
    %c0_i32_0 = arith.constant 0 : i32
    %c0_i32_1 = arith.constant 0 : i32
    return %c0_i32, %c0_i32_0 : i32, i32
  }
  func.func @transform_9(%arg0: i32) -> (i32, i32) {
    %c0_i32 = arith.constant 0 : i32
    %c0_i32_0 = arith.constant 0 : i32
    %c0_i32_1 = arith.constant 0 : i32
    return %c0_i32, %c0_i32_0 : i32, i32
  }
  func.func @transform_10(%arg0: i32) -> (i32, i32) {
    %c0_i32 = arith.constant 0 : i32
    %c0_i32_0 = arith.constant 0 : i32
    %c0_i32_1 = arith.constant 0 : i32
    return %c0_i32, %c0_i32_0 : i32, i32
  }
  func.func @transform_11(%arg0: i32) -> (i32, i32) {
    %c0_i32 = arith.constant 0 : i32
    %c0_i32_0 = arith.constant 0 : i32
    return %arg0, %c0_i32 : i32, i32
  }
}

</mosaic_0001>

<bundles_post_ra>
// kernel: tpu_custom_call.1
= control target key start
LH: loop header
LB: loop body
LE: loop exit
PB: predicated region body
PF: predicated region fallthrough
CT: control target
= control target key end

     0   :  { %16 = vsyncpa [#allocation3], 0  ;;  %s1511_s0 = inlined_call_operand.hbm [shape: f32[8,16], index: 0, kind: input, shape index: {}]   ;;  %s1512_s1 = inlined_call_operand.hbm [shape: f32[8,8], index: 1, kind: input, shape index: {}]   ;;  %s1513_s2 = inlined_call_operand.hbm [shape: bf16[16,256], index: 2, kind: input, shape index: {}]   ;;  %s1514_s3 = inlined_call_operand.hbm [shape: bf16[8,256], index: 3, kind: input, shape index: {}]   ;;  %s1515_s4 = inlined_call_operand.vmem [shape: f32[1,256], index: 4, kind: input, shape index: {}]   ;;  %s1516_s5 = inlined_call_operand.hbm [shape: bf16[256,256], index: 5, kind: input, shape index: {}]   ;;  %s1517_s6 = inlined_call_operand.vmem [shape: f32[1,256], index: 6, kind: input, shape index: {}]   ;;  %s1518_s7 = inlined_call_operand.hbm [shape: bf16[256,256], index: 7, kind: input, shape index: {}]   ;;  %s1519_s8 = inlined_call_operand.vmem [shape: f32[1,256], index: 8, kind: input, shape index: {}]   ;;  %s1520_s9 = inlined_call_operand.hbm [shape: bf16[256,128], index: 9, kind: input, shape index: {}]   ;;  %s1521_s10 = inlined_call_operand.vmem [shape: f32[1,128], index: 10, kind: input, shape index: {}]   ;;  %s1522_s11 = inlined_call_operand.hbm [shape: f32[8,128], index: 11, kind: output, shape index: {}]  }
   0x1   :  { %17 = vsyncpa [#allocation6], 0 }
   0x2   :  { %18 = vsyncpa [#allocation9], 0 }
   0x3   :  { %19 = vsyncpa [#allocation12], 0 }
   0x4   :  { %20 = vsyncpa [#allocation4], 0  ;;  %s1383_s17 = smov [#allocation5]   ;;  %s1384_s19 = smov [#allocation8]  }
   0x5   :  { %s37_s18 = sshll.u32 %s1383_s17, 4  ;;  %s59_s20 = sshll.u32 %s1384_s19, 4  ;;  %s38_s18 = int_to_ptr.vmem [resolvable:$true] %s37_s18  ;;  %s60_s20 = int_to_ptr.vmem [resolvable:$true] %s59_s20 }
   0x6   :  { %s1221_s21 = scalar_lea.vmem %s38_s18, 128  ;;  %p1226_p1 = scmp.lt.s32.totalorder %s38_s18, %s38_s18 }
   0x7   :  { %p1222_p0 = scmp.ne.s32.totalorder %s38_s18, %s1221_s21  ;;  %p1227_p2 = scmp.lt.s32.totalorder %s1221_s21, %s1221_s21 }
   0x9   :  { %p1228_p3 = por %p1227_p2, %p1226_p1 }
   0xb   :  { %p1229_p4 = pnand %p1228_p3, %p1222_p0 }
   0xd   :  { %1232 = shalt.err (!%p1229_p4)
}
   0xe   :  { %40 = dma.hbm_to_vmem [thread:$0]  %s1512_s1, 128, %s38_s18, [#allocation6]  }
   0xf   :  { %s1241_s24 = scalar_lea.vmem %s60_s20, 128  ;;  %p1246_p6 = scmp.lt.s32.totalorder %s60_s20, %s60_s20 }
  0x10   :  { %p1242_p5 = scmp.ne.s32.totalorder %s60_s20, %s1241_s24  ;;  %p1247_p7 = scmp.lt.s32.totalorder %s1241_s24, %s1241_s24 }
  0x12   :  { %p1248_p8 = por %p1247_p7, %p1246_p6 }
  0x14   :  { %p1249_p9 = pnand %p1248_p8, %p1242_p5 }
  0x16   :  { %1252 = shalt.err (!%p1249_p9)
}
  0x17   :  { %62 = dma.hbm_to_vmem [thread:$0]  %s1514_s3, 128, %s60_s20, [#allocation9]  }
  0x18   :  { %s1385_s27 = smov [#allocation11]   ;;  %s1386_s29 = smov [#allocation2]  }
  0x19   :  { %s84_s28 = sshll.u32 %s1385_s27, 4  ;;  %s27_s30 = sshll.u32 %s1386_s29, 4  ;;  %s85_s28 = int_to_ptr.vmem [resolvable:$true] %s84_s28  ;;  %s28_s30 = int_to_ptr.vmem [resolvable:$true] %s27_s30 }
  0x1a   :  { %s1261_s12 = scalar_lea.vmem %s85_s28, 4096  ;;  %p1266_p11 = scmp.lt.s32.totalorder %s85_s28, %s85_s28 }
  0x1b   :  { %p1262_p10 = scmp.ne.s32.totalorder %s85_s28, %s1261_s12  ;;  %p1267_p12 = scmp.lt.s32.totalorder %s1261_s12, %s1261_s12 }
  0x1d   :  { %p1268_p13 = por %p1267_p12, %p1266_p11 }
  0x1f   :  { %p1269_p0 = pnand %p1268_p13, %p1262_p10 }
  0x21   :  { %1272 = shalt.err (!%p1269_p0)
}
  0x22   :  { %s1387_s1 = smov 128   ;;  %s1388_s13 = smov 8  }
  0x23   :  { %90 = dma.hbm_to_vmem [thread:$0]  %s1518_s7, 4096, %s85_s28, [#allocation12], %s1387_s1, %s1387_s1, %s1388_s13  }
  0x24   :  { %s1281_s15 = scalar_lea.vmem %s28_s30, 128  ;;  %p1286_p2 = scmp.lt.s32.totalorder %s28_s30, %s28_s30 }
  0x25   :  { %p1282_p1 = scmp.ne.s32.totalorder %s28_s30, %s1281_s15  ;;  %p1287_p3 = scmp.lt.s32.totalorder %s1281_s15, %s1281_s15 }
  0x27   :  { %p1288_p4 = por %p1287_p3, %p1286_p2 }
  0x29   :  { %p1289_p5 = pnand %p1288_p4, %p1282_p1 }
  0x2b   :  { %1292 = shalt.err (!%p1289_p5)
}
  0x2c   :  { %30 = dma.hbm_to_vmem [thread:$0]  %s1511_s0, 128, %s28_s30, [#allocation3]  }
  0x2d   :  { %s1389_s18 = smov [#allocation7]   ;;  %s1390_s20 = smov [#allocation10]  }
  0x2e   :  { %s46_s19 = sshll.u32 %s1389_s18, 4  ;;  %s70_s21 = sshll.u32 %s1390_s20, 4  ;;  %s47_s19 = int_to_ptr.vmem [resolvable:$true] %s46_s19  ;;  %s71_s21 = int_to_ptr.vmem [resolvable:$true] %s70_s21 }
  0x2f   :  { %s1301_s22 = scalar_lea.vmem %s47_s19, 256  ;;  %p1306_p7 = scmp.lt.s32.totalorder %s47_s19, %s47_s19 }
  0x30   :  { %p1302_p6 = scmp.ne.s32.totalorder %s47_s19, %s1301_s22  ;;  %p1307_p8 = scmp.lt.s32.totalorder %s1301_s22, %s1301_s22 }
  0x32   :  { %p1308_p9 = por %p1307_p8, %p1306_p7 }
  0x34   :  { %p1309_p10 = pnand %p1308_p9, %p1302_p6 }
  0x36   :  { %1312 = shalt.err (!%p1309_p10)
}
  0x37   :  { %52 = dma.hbm_to_vmem [thread:$0]  %s1513_s2, 256, %s47_s19, [#allocation6], %s1387_s1, %s1387_s1, %s1388_s13  }
  0x38   :  { %s1321_s0 = scalar_lea.vmem %s71_s21, 4096  ;;  %p1326_p12 = scmp.lt.s32.totalorder %s71_s21, %s71_s21 }
  0x39   :  { %p1322_p11 = scmp.ne.s32.totalorder %s71_s21, %s1321_s0  ;;  %p1327_p13 = scmp.lt.s32.totalorder %s1321_s0, %s1321_s0 }
  0x3b   :  { %p1328_p0 = por %p1327_p13, %p1326_p12 }
  0x3d   :  { %p1329_p1 = pnand %p1328_p0, %p1322_p11 }
  0x3f   :  { %1332 = shalt.err (!%p1329_p1)
}
  0x40   :  { %76 = dma.hbm_to_vmem [thread:$0]  %s1516_s5, 4096, %s71_s21, [#allocation9], %s1387_s1, %s1387_s1, %s1388_s13  }
  0x41   :  { %s1391_s26 = smov [#allocation13]  }
  0x42   :  { %s98_s27 = sshll.u32 %s1391_s26, 4  ;;  %s99_s27 = int_to_ptr.vmem [resolvable:$true] %s98_s27 }
  0x43   :  { %s1341_s28 = scalar_lea.vmem %s99_s27, 2048  ;;  %p1346_p3 = scmp.lt.s32.totalorder %s99_s27, %s99_s27 }
  0x44   :  { %p1342_p2 = scmp.ne.s32.totalorder %s99_s27, %s1341_s28  ;;  %p1347_p4 = scmp.lt.s32.totalorder %s1341_s28, %s1341_s28 }
  0x46   :  { %p1348_p5 = por %p1347_p4, %p1346_p3 }
  0x48   :  { %p1349_p6 = pnand %p1348_p5, %p1342_p2 }
  0x4a   :  { %1352 = shalt.err (!%p1349_p6)
}
  0x4b   :  { %s1392_s2 = smov 64   ;;  %s1393_s29 = smov 4  }
  0x4c   :  { %104 = dma.hbm_to_vmem [thread:$0]  %s1520_s9, 2048, %s99_s27, [#allocation12], %s1392_s2, %s1392_s2, %s1393_s29  }
  0x4d   :  { %1373 = dma.done.wait [#allocation3], 128  }
  0x4e   :  { %1374 = vsyncadd [#allocation3], 4294967168 }
  0x4f   :  { %1375 = dma.done.wait [#allocation6], 384  }
  0x50   :  { %1376 = vsyncadd [#allocation6], 4294966912 }
  0x51   :  { %1377 = dma.done.wait [#allocation9], 4224  }
  0x52   :  { %1378 = vsyncadd [#allocation9], 4294963072 }
  0x53   :  { %1379 = dma.done.wait [#allocation12], 6144  }
  0x54   :  { %1380 = vsyncadd [#allocation12], 4294961152  ;;  %v1394_v0 = vmov 0   ;;  %v135_v1 = vld [vmem:[#allocation8] sm:$0xff]  ;;  %vm145_vm0 = vcmask 1043456   ;;  %v131_v2 = vld [vmem:[#allocation5] sm:$0xff] }
  0x55   :  { %184 = vmatprep.mubr.bf16.mxu1 %v1394_v0  ;;  %v970_v3 = vcombine.high %v135_v1, %v135_v1  ;;  %v969_v4 = vcombine.low %v135_v1, %v135_v1  ;;  %v1096_v5 = vld [vmem:[#allocation7 + $0x4] ss:$8 sps:$4 sm:$0xff]   ;;  %v132_v7 = vpack.c.bf16 %v131_v2, %v131_v2  ;;  %v1099_v9 = vld [vmem:[#allocation10 + $0x70] ss:$8 sps:$4 sm:$0xff]   ;;  %vm141_vm1 = vcmask 64512   ;;  %s1395_s3 = smov [#allocation14]  }
  0x56   :  { %v1097_v8 = vld [vmem:[#allocation10 + $0x74] ss:$8 sps:$4 sm:$0xff]   ;;  %v1094_v10 = vld [vmem:[#allocation7] ss:$8 sps:$4 sm:$0xff]   ;;  %v1100_v11 = vld [vmem:[#allocation10 + $0x64] ss:$8 sps:$4 sm:$0xff]  }
  0x57   :  { %971 = vmatprep.subr.msk.bf16.mxu1 %vm145_vm0, %v970_v3  ;;  %v147_v6 = vsel %vm145_vm0, %v969_v4, 0  ;;  %472 = vmatprep.subr.bf16.mxu0 %v1097_v8  ;;  %v1102_v12 = vld [vmem:[#allocation10 + $0x60] ss:$8 sps:$4 sm:$0xff]   ;;  %v1103_v13 = vld [vmem:[#allocation10 + $0x54] ss:$8 sps:$4 sm:$0xff]   ;;  %vm203_vm2 = vcmask 130048  }
  0x58   :  { %167 = vmatpush1.bf16.msra.mxu1 %v147_v6  ;;  %473 = vmatpush1.bf16.msra.mxu0 %v1099_v9  ;;  %v129_v14 = vld [vmem:[#allocation2] sm:$0xff]  ;;  %v1106_v17 = vld [vmem:[#allocation10 + $0x44] ss:$8 sps:$4 sm:$0xff]   ;;  %v1108_v18 = vld [vmem:[#allocation10 + $0x40] ss:$8 sps:$4 sm:$0xff]   ;;  %s957_s15 = sshll.u32 %s1395_s3, 4  ;;  %s958_s15 = int_to_ptr.vmem [resolvable:$true] %s957_s15 }
  0x59   :  { %221 = vmatprep.subr.bf16.mxu1 %v1096_v5  ;;  %474 = vmatprep.subr.bf16.mxu0 %v1100_v11  ;;  %v1105_v15 = vld [vmem:[#allocation10 + $0x50] ss:$8 sps:$4 sm:$0xff]   ;;  %v130_v16 = vpack.c.bf16 %v129_v14, %v129_v14  ;;  %v1109_v19 = vld [vmem:[#allocation10 + $0x34] ss:$8 sps:$4 sm:$0xff]   ;;  %v1112_v21 = vld [vmem:[#allocation10 + $0x24] ss:$8 sps:$4 sm:$0xff]   ;;  %v250_v5 = vlaneseq  ;;  %p1358_p8 = scmp.lt.s32.totalorder %s958_s15, %s958_s15 }
  0x5a   :  { %v1111_v20 = vld [vmem:[#allocation10 + $0x30] ss:$8 sps:$4 sm:$0xff]   ;;  %v1114_v22 = vld [vmem:[#allocation10 + $0x20] ss:$8 sps:$4 sm:$0xff]   ;;  %v1115_v23 = vld [vmem:[#allocation10 + $0x14] ss:$8 sps:$4 sm:$0xff]  }
  0x5b   :  { %972 = vmatmul.mubr.msk.bf16.vlgmr.msra.gmra.mxu1 %vm141_vm1, %v132_v7  ;;  %v1117_v24 = vld [vmem:[#allocation10 + $0x10] ss:$8 sps:$4 sm:$0xff]   ;;  %v1118_v25 = vld [vmem:[#allocation10 + $0x4] ss:$8 sps:$4 sm:$0xff]   ;;  %v1120_v26 = vld [vmem:[#allocation10] ss:$8 sps:$4 sm:$0xff]  }
  0x5c   :  { %222 = vmatpush1.bf16.msra.mxu1 %v1094_v10  ;;  %239 = vmatprep.mubr.bf16.mxu1 %v1394_v0  ;;  %v1121_v27 = vld [vmem:[#allocation10 + $0xf4] ss:$8 sps:$4 sm:$0xff]   ;;  %v1123_v28 = vld [vmem:[#allocation10 + $0xf0] ss:$8 sps:$4 sm:$0xff]   ;;  %v1124_v29 = vld [vmem:[#allocation10 + $0xe4] ss:$8 sps:$4 sm:$0xff]  }
  0x5d   :  { %475 = vmatpush1.bf16.msra.mxu0 %v1102_v12  ;;  %v1126_v30 = vld [vmem:[#allocation10 + $0xe0] ss:$8 sps:$4 sm:$0xff]   ;;  %v1127_v31 = vld [vmem:[#allocation10 + $0xd4] ss:$8 sps:$4 sm:$0xff]   ;;  %v1129_v32 = vld [vmem:[#allocation10 + $0xd0] ss:$8 sps:$4 sm:$0xff]  }
  0x5e   :  { %476 = vmatprep.subr.bf16.mxu0 %v1103_v13  ;;  %v1130_v33 = vld [vmem:[#allocation10 + $0xc4] ss:$8 sps:$4 sm:$0xff]   ;;  %v1132_v34 = vld [vmem:[#allocation10 + $0xc0] ss:$8 sps:$4 sm:$0xff]   ;;  %v1133_v35 = vld [vmem:[#allocation10 + $0xb4] ss:$8 sps:$4 sm:$0xff]  }
  0x5f   :  { %v1135_v36 = vld [vmem:[#allocation10 + $0xb0] ss:$8 sps:$4 sm:$0xff]   ;;  %v1136_v37 = vld [vmem:[#allocation10 + $0xa4] ss:$8 sps:$4 sm:$0xff]   ;;  %v1138_v38 = vld [vmem:[#allocation10 + $0xa0] ss:$8 sps:$4 sm:$0xff]  }
  0x60   :  { %v1139_v39 = vld [vmem:[#allocation10 + $0x94] ss:$8 sps:$4 sm:$0xff]   ;;  %v1141_v40 = vld [vmem:[#allocation10 + $0x90] ss:$8 sps:$4 sm:$0xff]   ;;  %v1142_v41 = vld [vmem:[#allocation10 + $0x84] ss:$8 sps:$4 sm:$0xff]  }
  0x61   :  { %477 = vmatpush1.bf16.msra.mxu0 %v1105_v15  ;;  %v1144_v42 = vld [vmem:[#allocation10 + $0x80] ss:$8 sps:$4 sm:$0xff]   ;;  %v1145_v43 = vld [vmem:[#allocation11 + $0x70] ss:$8 sps:$4 sm:$0xff]   ;;  %v1147_v44 = vld [vmem:[#allocation11 + $0x74] ss:$8 sps:$4 sm:$0xff]  }
  0x62   :  { %478 = vmatprep.subr.bf16.mxu0 %v1106_v17  ;;  %v1150_v45 = vld [vmem:[#allocation11 + $0x64] ss:$8 sps:$4 sm:$0xff]   ;;  %723 = vmatprep.subr.bf16.mxu1 %v1147_v44  ;;  %v1148_v46 = vld [vmem:[#allocation11 + $0x60] ss:$8 sps:$4 sm:$0xff]   ;;  %v1153_v47 = vld [vmem:[#allocation11 + $0x54] ss:$8 sps:$4 sm:$0xff]  }
  0x63   :  { %975 = vmatmul.mubr.msk.bf16.vlgmr.msra.gmra.mxu1 %vm203_vm2, %v130_v16  ;;  %v1151_v48 = vld [vmem:[#allocation11 + $0x50] ss:$8 sps:$4 sm:$0xff]   ;;  %v1156_v49 = vld [vmem:[#allocation11 + $0x44] ss:$8 sps:$4 sm:$0xff]   ;;  %v1154_v50 = vld [vmem:[#allocation11 + $0x40] ss:$8 sps:$4 sm:$0xff]  }
  0x64   :  { %724 = vmatpush1.bf16.msra.mxu1 %v1145_v43  ;;  %v1159_v51 = vld [vmem:[#allocation11 + $0x34] ss:$8 sps:$4 sm:$0xff]   ;;  %v1157_v52 = vld [vmem:[#allocation11 + $0x30] ss:$8 sps:$4 sm:$0xff]   ;;  %v1162_v53 = vld [vmem:[#allocation11 + $0x24] ss:$8 sps:$4 sm:$0xff]  }
  0x65   :  { %479 = vmatpush1.bf16.msra.mxu0 %v1108_v18  ;;  %725 = vmatprep.subr.bf16.mxu1 %v1150_v45  ;;  %v1160_v54 = vld [vmem:[#allocation11 + $0x20] ss:$8 sps:$4 sm:$0xff]   ;;  %v1165_v55 = vld [vmem:[#allocation11 + $0x14] ss:$8 sps:$4 sm:$0xff]   ;;  %v1163_v56 = vld [vmem:[#allocation11 + $0x10] ss:$8 sps:$4 sm:$0xff]  }
  0x66   :  { %480 = vmatprep.subr.bf16.mxu0 %v1109_v19  ;;  %v1168_v57 = vld [vmem:[#allocation11 + $0x4] ss:$8 sps:$4 sm:$0xff]   ;;  %v1166_v58 = vld [vmem:[#allocation11] ss:$8 sps:$4 sm:$0xff]   ;;  %v1171_v59 = vld [vmem:[#allocation11 + $0xf4] ss:$8 sps:$4 sm:$0xff]  }
  0x67   :  { %v1169_v60 = vld [vmem:[#allocation11 + $0xf0] ss:$8 sps:$4 sm:$0xff]   ;;  %v1174_v61 = vld [vmem:[#allocation11 + $0xe4] ss:$8 sps:$4 sm:$0xff]   ;;  %v1172_v62 = vld [vmem:[#allocation11 + $0xe0] ss:$8 sps:$4 sm:$0xff]  }
  0x68   :  { %726 = vmatpush1.bf16.msra.mxu1 %v1148_v46  ;;  %v1177_v63 = vld [vmem:[#allocation11 + $0xd4] ss:$8 sps:$4 sm:$0xff]   ;;  %v1175_v0 = vld [vmem:[#allocation11 + $0xd0] ss:$8 sps:$4 sm:$0xff]   ;;  %v1180_v1 = vld [vmem:[#allocation11 + $0xc4] ss:$8 sps:$4 sm:$0xff]  }
  0x69   :  { %481 = vmatpush1.bf16.msra.mxu0 %v1111_v20  ;;  %727 = vmatprep.subr.bf16.mxu1 %v1153_v47  ;;  %v1178_v2 = vld [vmem:[#allocation11 + $0xc0] ss:$8 sps:$4 sm:$0xff]   ;;  %v1183_v3 = vld [vmem:[#allocation11 + $0xb4] ss:$8 sps:$4 sm:$0xff]   ;;  %v1181_v4 = vld [vmem:[#allocation11 + $0xb0] ss:$8 sps:$4 sm:$0xff]  }
  0x6a   :  { %482 = vmatprep.subr.bf16.mxu0 %v1112_v21  ;;  %v251_v6 = vshrl.u32 %v250_v5, 7  ;;  %v248_v11 = vld [vmem:[%s1515_s4] sm:$0x3]  ;;  %v1200_v43 = vld [vmem:[#allocation13 + $0x20] sm:$0xff]   ;;  %s1353_s16 = scalar_lea.vmem %s958_s15, 128 }
  0x6b   :  { %v1201_v44 = vld [vmem:[#allocation13 + $0x58] sm:$0xff]   ;;  %p1354_p7 = scmp.ne.s32.totalorder %s958_s15, %s1353_s16  ;;  %p1359_p9 = scmp.lt.s32.totalorder %s1353_s16, %s1353_s16 }
  0x6c   :  { %728 = vmatpush1.bf16.msra.mxu1 %v1151_v48  ;;  %v1486_v9 = vsub.s32 0, %v251_v6  ;;  %v1491_v12 = vsub.s32 1, %v251_v6  ;;  %v1202_v45 = vld [vmem:[#allocation13 + $0x18] sm:$0xff]  }
  0x6d   :  { %483 = vmatpush1.bf16.msra.mxu0 %v1114_v22  ;;  %729 = vmatprep.subr.bf16.mxu1 %v1156_v49  ;;  %v300_v46 = vld [vmem:[%s1517_s6] sm:$0x3]  ;;  %p1360_p10 = por %p1359_p9, %p1358_p8 }
  0x6e   :  { %484 = vmatprep.subr.bf16.mxu0 %v1115_v23  ;;  %v253_v14 = vrot.slane %v248_v11, %v1486_v9  ;;  %v257_v17 = vrot.slane %v248_v11, %v1491_v12  ;;  %v305_v47 = vrot.slane %v300_v46, %v1486_v9  ;;  %v309_v48 = vrot.slane %v300_v46, %v1491_v12 }
  0x6f   :  { %p1361_p11 = pnand %p1360_p10, %p1354_p7 }
  0x70   :  { %730 = vmatpush1.bf16.msra.mxu1 %v1154_v50 }
  0x71   :  { %485 = vmatpush1.bf16.msra.mxu0 %v1117_v24  ;;  %731 = vmatprep.subr.bf16.mxu1 %v1159_v51 }
  0x72   :  { %486 = vmatprep.subr.bf16.mxu0 %v1118_v25 }
  0x74   :  { %732 = vmatpush1.bf16.msra.mxu1 %v1157_v52 }
  0x75   :  { %487 = vmatpush1.bf16.msra.mxu0 %v1120_v26  ;;  %733 = vmatprep.subr.bf16.mxu1 %v1162_v53 }
  0x76   :  { %488 = vmatprep.subr.bf16.mxu0 %v1121_v27 }
  0x78   :  { %734 = vmatpush1.bf16.msra.mxu1 %v1160_v54 }
  0x79   :  { %489 = vmatpush2.bf16.msra.mxu0 %v1123_v28  ;;  %735 = vmatprep.subr.bf16.mxu1 %v1165_v55 }
  0x7a   :  { %490 = vmatprep.subr.bf16.mxu0 %v1124_v29 }
  0x7c   :  { %736 = vmatpush1.bf16.msra.mxu1 %v1163_v56 }
  0x7d   :  { %491 = vmatpush2.bf16.msra.mxu0 %v1126_v30  ;;  %737 = vmatprep.subr.bf16.mxu1 %v1168_v57  ;;  %v1186_v30 = vld [vmem:[#allocation11 + $0xa4] ss:$8 sps:$4 sm:$0xff]  }
  0x7e   :  { %492 = vmatprep.subr.bf16.mxu0 %v1127_v31  ;;  %v1184_v31 = vld [vmem:[#allocation11 + $0xa0] ss:$8 sps:$4 sm:$0xff]  }
  0x80   :  { %738 = vmatpush1.bf16.msra.mxu1 %v1166_v58 }
  0x81   :  { %493 = vmatpush2.bf16.msra.mxu0 %v1129_v32  ;;  %739 = vmatprep.subr.bf16.mxu1 %v1171_v59  ;;  %v1189_v32 = vld [vmem:[#allocation11 + $0x94] ss:$8 sps:$4 sm:$0xff]  }
  0x82   :  { %494 = vmatprep.subr.bf16.mxu0 %v1130_v33  ;;  %v1187_v33 = vld [vmem:[#allocation11 + $0x90] ss:$8 sps:$4 sm:$0xff]  }
  0x84   :  { %740 = vmatpush2.bf16.msra.mxu1 %v1169_v60 }
  0x85   :  { %495 = vmatpush2.bf16.msra.mxu0 %v1132_v34  ;;  %741 = vmatprep.subr.bf16.mxu1 %v1174_v61  ;;  %v1192_v34 = vld [vmem:[#allocation11 + $0x84] ss:$8 sps:$4 sm:$0xff]   ;;  %v1203_v61 = vld [vmem:[#allocation13 + $0x50] sm:$0xff]  }
  0x86   :  { %496 = vmatprep.subr.bf16.mxu0 %v1133_v35  ;;  %v1190_v35 = vld [vmem:[#allocation11 + $0x80] ss:$8 sps:$4 sm:$0xff]  }
  0x88   :  { %742 = vmatpush2.bf16.msra.mxu1 %v1172_v62  ;;  %v1204_v62 = vld [vmem:[#allocation13 + $0x10] sm:$0xff]  }
  0x89   :  { %497 = vmatpush2.bf16.msra.mxu0 %v1135_v36  ;;  %743 = vmatprep.subr.bf16.mxu1 %v1177_v63  ;;  %v1193_v36 = vld [vmem:[#allocation13 + $0x78] sm:$0xff]   ;;  %v1205_v63 = vld [vmem:[#allocation13 + $0x48] sm:$0xff]  }
  0x8a   :  { %498 = vmatprep.subr.bf16.mxu0 %v1136_v37  ;;  %v1194_v37 = vld [vmem:[#allocation13 + $0x38] sm:$0xff]  }
  0x8c   :  { %744 = vmatpush2.bf16.msra.mxu1 %v1175_v0  ;;  %v1206_v0 = vld [vmem:[#allocation13 + $0x8] sm:$0xff]  }
  0x8d   :  { %499 = vmatpush2.bf16.msra.mxu0 %v1138_v38  ;;  %745 = vmatprep.subr.bf16.mxu1 %v1180_v1  ;;  %v1195_v38 = vld [vmem:[#allocation13 + $0x70] sm:$0xff]   ;;  %v1207_v1 = vld [vmem:[#allocation13 + $0x40] sm:$0xff]  }
  0x8e   :  { %500 = vmatprep.subr.bf16.mxu0 %v1139_v39  ;;  %v1196_v39 = vld [vmem:[#allocation13 + $0x30] sm:$0xff]  }
  0x90   :  { %746 = vmatpush2.bf16.msra.mxu1 %v1178_v2  ;;  %v1208_v2 = vld [vmem:[#allocation13] sm:$0xff]  }
  0x91   :  { %501 = vmatpush2.bf16.msra.mxu0 %v1141_v40  ;;  %747 = vmatprep.subr.bf16.mxu1 %v1183_v3  ;;  %v1197_v40 = vld [vmem:[#allocation13 + $0x68] sm:$0xff]   ;;  %v551_v3 = vld [vmem:[%s1519_s8] sm:$0x3] }
  0x92   :  { %502 = vmatprep.subr.bf16.mxu0 %v1142_v41  ;;  %v1198_v41 = vld [vmem:[#allocation13 + $0x28] sm:$0xff]   ;;  %v560_v5 = vrot.slane %v551_v3, %v1491_v12 }
  0x94   :  { %748 = vmatpush2.bf16.msra.mxu1 %v1181_v4  ;;  %v556_v4 = vrot.slane %v551_v3, %v1486_v9  ;;  %v1040_v9 = vld [vmem:[%s1521_s10] ss:$0 sm:$0xff] }
  0x95   :  { %503 = vmatpush2.bf16.msra.mxu0 %v1144_v42  ;;  %749 = vmatprep.subr.bf16.mxu1 %v1186_v30  ;;  %v1199_v42 = vld [vmem:[#allocation13 + $0x60] sm:$0xff]  }
  0x96   :  { %1057 = vmatprep.subr.bf16.mxu0 %v1193_v36 }
  0x98   :  { %750 = vmatpush2.bf16.msra.mxu1 %v1184_v31 }
  0x99   :  { %751 = vmatprep.subr.bf16.mxu1 %v1189_v32 }
  0x9c   :  { %752 = vmatpush2.bf16.msra.mxu1 %v1187_v33 }
  0x9d   :  { %753 = vmatprep.subr.bf16.mxu1 %v1192_v34 }
  0xa0   :  { %754 = vmatpush2.bf16.msra.mxu1 %v1190_v35 }
 0x11b   :  { %v186_v7 = vpop.f32.mrf.mxu1 }
 0x11d   :  { %v188_v8 = vpop.f32.mrf.mxu1 }
 0x11f   :  { %v190_v10 = vpop.f32.mrf.mxu1 }
 0x121   :  { %v191_v13 = vpop.f32.mrf.mxu1 }
 0x123   :  { %v241_v15 = vpop.f32.mrf.mxu1 }
 0x124   :  { %v242_v16 = vadd.f32 %v241_v15, %v186_v7 }
 0x125   :  { %v243_v18 = vpop.f32.mrf.mxu1 }
 0x126   :  { %v260_v19 = vadd.f32 %v253_v14, %v242_v16  ;;  %v244_v20 = vadd.f32 %v243_v18, %v188_v8 }
 0x127   :  { %v245_v21 = vpop.f32.mrf.mxu1 }
 0x128   :  { %v262_v22 = vmul.f32 0.01, %v260_v19  ;;  %v261_v23 = vadd.f32 %v257_v17, %v244_v20 }
 0x129   :  { %v246_v24 = vpop.f32.mrf.mxu1 }
 0x12a   :  { %v263_v25 = vmul.f32 0.01, %v261_v23  ;;  %v264_v26 = vmax.f32 %v260_v19, %v262_v22 }
 0x12c   :  { %v265_v27 = vmax.f32 %v261_v23, %v263_v25  ;;  %v266_v29 = vpack.c.bf16 %v264_v26, %v264_v26 }
 0x12e   :  { %v267_v28 = vpack.c.bf16 %v265_v27, %v265_v27 }
 0x130   :  { %504 = vmatprep.mubr.bf16.mxu0 %v267_v28 }
 0x131   :  { %505 = vmatmul.mubr.bf16.vlgmr.msra.gmra.mxu0 %v266_v29 }
 0x132   :  { %1058 = vmatpush3.bf16.msra.mxu0 %v1194_v37 }
 0x133   :  { %1059 = vmatprep.subr.bf16.mxu0 %v1195_v38 }
 0x136   :  { %1060 = vmatpush3.bf16.msra.mxu0 %v1196_v39 }
 0x137   :  { %1061 = vmatprep.subr.bf16.mxu0 %v1197_v40 }
 0x13a   :  { %1062 = vmatpush3.bf16.msra.mxu0 %v1198_v41 }
 0x13b   :  { %1063 = vmatprep.subr.bf16.mxu0 %v1199_v42 }
 0x13e   :  { %1064 = vmatpush3.bf16.msra.mxu0 %v1200_v43 }
 0x13f   :  { %1065 = vmatprep.subr.bf16.mxu0 %v1201_v44 }
 0x142   :  { %1066 = vmatpush3.bf16.msra.mxu0 %v1202_v45 }
 0x143   :  { %1067 = vmatprep.subr.bf16.mxu0 %v1203_v61 }
 0x146   :  { %1068 = vmatpush3.bf16.msra.mxu0 %v1204_v62 }
 0x147   :  { %1069 = vmatprep.subr.bf16.mxu0 %v1205_v63 }
 0x14a   :  { %1070 = vmatpush3.bf16.msra.mxu0 %v1206_v0 }
 0x14b   :  { %1071 = vmatprep.subr.bf16.mxu0 %v1207_v1 }
 0x14e   :  { %1072 = vmatpush3.bf16.msra.mxu0 %v1208_v2 }
 0x1f1   :  { %v506_v49 = vpop.f32.mrf.mxu0 }
 0x1f2   :  { %v507_v50 = vadd.f32 %v506_v49, %v305_v47 }
 0x1f3   :  { %v508_v51 = vpop.f32.mrf.mxu0 }
 0x1f4   :  { %v513_v52 = vmul.f32 0.01, %v507_v50  ;;  %v509_v53 = vadd.f32 %v508_v51, %v309_v48 }
 0x1f5   :  { %v510_v54 = vpop.f32.mrf.mxu0 }
 0x1f6   :  { %v514_v55 = vmul.f32 0.01, %v509_v53  ;;  %v515_v56 = vmax.f32 %v507_v50, %v513_v52 }
 0x1f7   :  { %v511_v57 = vpop.f32.mrf.mxu0 }
 0x1f8   :  { %v516_v58 = vmax.f32 %v509_v53, %v514_v55  ;;  %v517_v60 = vpack.c.bf16 %v515_v56, %v515_v56 }
 0x1fa   :  { %v518_v59 = vpack.c.bf16 %v516_v58, %v516_v58 }
 0x1fc   :  { %755 = vmatprep.mubr.bf16.mxu1 %v518_v59 }
 0x1fd   :  { %756 = vmatmul.mubr.bf16.vlgmr.msra.gmra.mxu1 %v517_v60 }
 0x2bd   :  { %v757_v6 = vpop.f32.mrf.mxu1 }
 0x2be   :  { %v758_v7 = vadd.f32 %v757_v6, %v556_v4 }
 0x2bf   :  { %v759_v8 = vpop.f32.mrf.mxu1 }
 0x2c0   :  { %v764_v10 = vmul.f32 0.01, %v758_v7  ;;  %v760_v11 = vadd.f32 %v759_v8, %v560_v5 }
 0x2c1   :  { %v761_v13 = vpop.f32.mrf.mxu1 }
 0x2c2   :  { %v765_v14 = vmul.f32 0.01, %v760_v11  ;;  %v766_v15 = vmax.f32 %v758_v7, %v764_v10 }
 0x2c3   :  { %v762_v16 = vpop.f32.mrf.mxu1 }
 0x2c4   :  { %v767_v17 = vmax.f32 %v760_v11, %v765_v14  ;;  %v768_v19 = vpack.c.bf16 %v766_v15, %v766_v15 }
 0x2c6   :  { %v769_v18 = vpack.c.bf16 %v767_v17, %v767_v17 }
 0x2c8   :  { %937 = vmatprep.mubr.bf16.mxu0 %v769_v18 }
 0x2c9   :  { %938 = vmatmul.mubr.bf16.vlgmr.msra.gmra.mxu0 %v768_v19 }
 0x389   :  { %v1073_v20 = vpop.f32.mrf.mxu0 }
 0x38b   :  { %v1074_v12 = vpop.f32.mrf.mxu0 }
 0x38c   :  { %v1075_v21 = vadd.f32 %v1074_v12, %v1073_v20 }
 0x38d   :  { %v1076_v22 = vpop.f32.mrf.mxu0 }
 0x38e   :  { %v940_v23 = vadd.f32 %v1075_v21, %v1040_v9 }
 0x38f   :  { %v1077_v24 = vpop.f32.mrf.mxu0 }
 0x390   :  { %v945_v25 = vsub.f32 0.0, %v940_v23 }
 0x392   :  { %v946_v26 = vmul.f32 1.442695, %v945_v25 }
 0x394   :  { %1209 = vpow2.f32 %v946_v26 }
 0x3a1   :  { %v1210_v27 = vpop.eup %1209 }
 0x3a2   :  { %v948_v28 = vadd.f32 1.0, %v1210_v27 }
 0x3a4   :  { %1211 = vrcp.f32 %v948_v28 }
 0x3b1   :  { %v1212_v29 = vpop.eup %1211 }
 0x3b2   :  { %950 = vst [vmem:[#allocation14] sm:$0xff] %v1212_v29 }
 0x3b3   :  { %1364 = shalt.err (!%p1361_p11)
}
 0x3b4   :  { %960 = dma.vmem_to_hbm [thread:$0]  %s958_s15, 128, %s1522_s11, [#allocation4]  }
 0x3b5   :  { %1381 = dma.done.wait [#allocation4], 128  }
 0x3b6   :  { %1382 = vsyncadd [#allocation4], 4294967168 }
 0x3b7   :  { %964 = vsyncpa [#allocation3], 1 }
 0x3b8   :  { %965 = vsyncpa [#allocation6], 1 }
 0x3b9   :  { %966 = vsyncpa [#allocation9], 1 }
 0x3ba   :  { %967 = vsyncpa [#allocation12], 1 }
 0x3bb   :  { %968 = vsyncpa [#allocation4], 1 }

</bundles_post_ra>
